<compile_context>
chip_gen: v7x
topology: tpu7x:2x2x1
jax: 0.10.0
libtpu: 0.0.40
codegen_flags: <defaults>
</compile_context>

<pallas_src>
import functools

import jax
import jax.numpy as jnp
from jax.experimental import pallas as pl
from jax.experimental.pallas import tpu as pltpu

_VMEM_LIMIT_BYTES = 32 * 1024 * 1024     # safe on v5e/v6e/v7x
_STEP_BUDGET_BYTES = 20 * 1024 * 1024    # target per-step (double-buffered) footprint


def _pick_tile_rows(nrows, ncols, itemsize, nstreams):
    """Largest row tile whose double-buffered footprint fits the budget."""
    per_row = max(int(ncols), 1) * int(itemsize) * 2 * nstreams   # x2 = double buffering
    tr = max(1, _STEP_BUDGET_BYTES // per_row)
    if tr >= nrows:
        return nrows                       # full sublane extent is always legal
    return max(8, (tr // 8) * 8)           # multiple of 8 for the (8,128) tiling rule


# ---------------------------------------------------------------------------
# Pass 1a (4-D layout (N*C, H*W)): per-row sum / sum-of-squares.
# Rows are independent, so partial last tiles are safe: OOB rows produce
# garbage sums that are discarded by the masked OOB write.
# ---------------------------------------------------------------------------
def _row_stats_kernel(x_ref, sum_ref, sq_ref):
    x = x_ref[...].astype(jnp.float32)                     # (TR, HW)
    sum_ref[...] = jnp.sum(x, axis=1, keepdims=True)       # (TR, 1)
    sq_ref[...] = jnp.sum(x * x, axis=1, keepdims=True)


def _per_row_stats(x2d):
    nc, hw = x2d.shape
    tr = _pick_tile_rows(nc, hw, x2d.dtype.itemsize, nstreams=1)
    grid = (pl.cdiv(nc, tr),)
    return pl.pallas_call(
        _row_stats_kernel,
        grid=grid,
        in_specs=[pl.BlockSpec((tr, hw), lambda i: (i, 0))],
        out_specs=[pl.BlockSpec((tr, 1), lambda i: (i, 0)),
                   pl.BlockSpec((tr, 1), lambda i: (i, 0))],
        out_shape=[jax.ShapeDtypeStruct((nc, 1), jnp.float32),
                   jax.ShapeDtypeStruct((nc, 1), jnp.float32)],
        compiler_params=pltpu.CompilerParams(
            dimension_semantics=("parallel",),
            vmem_limit_bytes=_VMEM_LIMIT_BYTES),
    )(x2d)


# ---------------------------------------------------------------------------
# Pass 1b (2-D layout (N, C)): per-channel (column) sums, accumulated into
# grid-resident (1, C) outputs.  Rows beyond N are masked out so partial
# tiles never contaminate the accumulator.
# ---------------------------------------------------------------------------
def _col_stats_kernel(x_ref, sum_ref, sq_ref, *, total_rows, tile_rows):
    i = pl.program_id(0)

    @pl.when(i == 0)
    def _():
        sum_ref[...] = jnp.zeros_like(sum_ref)
        sq_ref[...] = jnp.zeros_like(sq_ref)

    x = x_ref[...].astype(jnp.float32)                     # (TR, C)
    row_ids = i * tile_rows + jax.lax.broadcasted_iota(jnp.int32, x.shape, 0)
    x = jnp.where(row_ids < total_rows, x, 0.0)
    sum_ref[...] += jnp.sum(x, axis=0, keepdims=True)      # (1, C)
    sq_ref[...] += jnp.sum(x * x, axis=0, keepdims=True)


def _per_col_stats(x2d):
    n, c = x2d.shape
    tr = _pick_tile_rows(n, c, x2d.dtype.itemsize, nstreams=1)
    grid = (pl.cdiv(n, tr),)
    kern = functools.partial(_col_stats_kernel, total_rows=n, tile_rows=tr)
    return pl.pallas_call(
        kern,
        grid=grid,
        in_specs=[pl.BlockSpec((tr, c), lambda i: (i, 0))],
        out_specs=[pl.BlockSpec((1, c), lambda i: (0, 0)),
                   pl.BlockSpec((1, c), lambda i: (0, 0))],
        out_shape=[jax.ShapeDtypeStruct((1, c), jnp.float32),
                   jax.ShapeDtypeStruct((1, c), jnp.float32)],
        compiler_params=pltpu.CompilerParams(
            dimension_semantics=("arbitrary",),
            vmem_limit_bytes=_VMEM_LIMIT_BYTES),
    )(x2d)


# ---------------------------------------------------------------------------
# Pass 2: y = x * scale + shift   (scale/shift already fold mean, rsqrt, affine)
#   4-D layout: scale/shift are per-row columns (N*C, 1)
#   2-D layout: scale/shift are per-channel rows (1, C)
# ---------------------------------------------------------------------------
def _normalize_kernel(x_ref, scale_ref, shift_ref, out_ref):
    x = x_ref[...].astype(jnp.float32)
    out_ref[...] = (x * scale_ref[...] + shift_ref[...]).astype(out_ref.dtype)


def _normalize(x2d, scale, shift, *, per_row_stats):
    r, c = x2d.shape
    tr = _pick_tile_rows(r, c, x2d.dtype.itemsize, nstreams=2)   # x tile + out tile
    grid = (pl.cdiv(r, tr),)
    if per_row_stats:
        stat_spec = pl.BlockSpec((tr, 1), lambda i: (i, 0))
    else:
        stat_spec = pl.BlockSpec((1, c), lambda i: (0, 0))
    return pl.pallas_call(
        _normalize_kernel,
        grid=grid,
        in_specs=[pl.BlockSpec((tr, c), lambda i: (i, 0)), stat_spec, stat_spec],
        out_specs=pl.BlockSpec((tr, c), lambda i: (i, 0)),
        out_shape=jax.ShapeDtypeStruct((r, c), x2d.dtype),
        compiler_params=pltpu.CompilerParams(
            dimension_semantics=("parallel",),
            vmem_limit_bytes=_VMEM_LIMIT_BYTES),
    )(x2d, scale, shift)


# ---------------------------------------------------------------------------
# Forward wrapper mirroring DynamicNorm.forward
# ---------------------------------------------------------------------------
def dynamic_norm_forward(x, running_mean=None, running_var=None,
                         weight=None, bias=None, num_batches_tracked=None,
                         *, eps=1e-5, momentum=0.1, affine=False,
                         track_running_stats=True, training=True):
    """Returns (output, new_running_mean, new_running_var, new_num_batches_tracked)."""
    if x.ndim == 4:
        n, c, h, w = x.shape
        x2d = x.reshape(n * c, h * w)          # free view, stays NCHW in HBM
        reduce_count = n * h * w
        layout_4d = True
    elif x.ndim == 2:
        n, c = x.shape
        x2d = x
        reduce_count = n
        layout_4d = False
    else:
        raise ValueError("DynamicNorm expects 2-D or 4-D input")

    # exponential_average_factor / num_batches_tracked bookkeeping (PyTorch semantics)
    eaf = 0.0 if momentum is None else momentum
    new_nbt = num_batches_tracked
    if training and track_running_stats and num_batches_tracked is not None:
        new_nbt = num_batches_tracked + 1
        if momentum is None:
            eaf = 1.0 / jnp.asarray(new_nbt, dtype=jnp.float32)   # cumulative moving avg
        else:
            eaf = momentum

    bn_training = training or (running_mean is None and running_var is None)

    if bn_training:
        # streaming stats pass (Pallas), finalize on (C,)-sized arrays in JAX
        if layout_4d:
            row_sum, row_sq = _per_row_stats(x2d)
            ch_sum = row_sum.reshape(n, c).sum(axis=0)
            ch_sq = row_sq.reshape(n, c).sum(axis=0)
        else:
            col_sum, col_sq = _per_col_stats(x2d)
            ch_sum = col_sum.reshape(c)
            ch_sq = col_sq.reshape(c)
        cnt = jnp.float32(reduce_count)
        mean = ch_sum / cnt
        var = jnp.maximum(ch_sq / cnt - mean * mean, 0.0)   # biased var (E[x^2]-mean^2)
    else:
        mean = running_mean.astype(jnp.float32)
        var = running_var.astype(jnp.float32)

    # running-stat EMA update (only when tracked and training-mode stats used)
    new_rm, new_rv = running_mean, running_var
    if bn_training and track_running_stats and running_mean is not None:
        n_f = float(reduce_count)
        # guard n==1: torch would produce inf running_var here
        unbias = n_f / (n_f - 1.0) if n_f > 1.0 else 1.0
        new_rm = (eaf * mean + (1.0 - eaf) * running_mean.astype(jnp.float32)
                  ).astype(running_mean.dtype)
        new_rv = (eaf * var * unbias + (1.0 - eaf) * running_var.astype(jnp.float32)
                  ).astype(running_var.dtype)

    # fold mean / rsqrt / optional affine into per-channel scale & shift
    inv = 1.0 / jnp.sqrt(var + eps)
    if affine and weight is not None:
        scale_c = inv * weight.astype(jnp.float32)
        shift_c = bias.astype(jnp.float32) - mean * scale_c
    else:
        scale_c = inv
        shift_c = -mean * inv

    if layout_4d:
        scale2d = jnp.tile(scale_c.reshape(1, c), (n, 1)).reshape(n * c, 1)
        shift2d = jnp.tile(shift_c.reshape(1, c), (n, 1)).reshape(n * c, 1)
        out = _normalize(x2d, scale2d, shift2d, per_row_stats=True).reshape(x.shape)
    else:
        out = _normalize(x2d, scale_c.reshape(1, c), shift_c.reshape(1, c),
                         per_row_stats=False)
    return out, new_rm, new_rv, new_nbt


# ---------------------------------------------------------------------------
# Self-test
# ---------------------------------------------------------------------------
if __name__ == "__main__":
    key = jax.random.PRNGKey(0)
    N, C, H, W = 2, 4, 16, 16
    x = jax.random.normal(key, (N, C, H, W), dtype=jnp.float32)

    running_mean = jnp.zeros((C,), jnp.float32)
    running_var = jnp.ones((C,), jnp.float32)
    weight = jnp.ones((C,), jnp.float32)       # only used if affine=True
    bias = jnp.zeros((C,), jnp.float32)
    nbt = jnp.array(0, jnp.int32)

    # --- training path (4-D) ---
    out, new_rm, new_rv, new_nbt = dynamic_norm_forward(
        x, running_mean, running_var, weight, bias, nbt,
        eps=1e-5, momentum=0.1, affine=False,
        track_running_stats=True, training=True)
    jax.block_until_ready((out, new_rm, new_rv))

    mean_ref = x.mean(axis=(0, 2, 3))
    var_ref = ((x - mean_ref.reshape(1, -1, 1, 1)) ** 2).mean(axis=(0, 2, 3))
    n_ref = x.size / C
    ref_out = (x - mean_ref.reshape(1, -1, 1, 1)) / jnp.sqrt(
        var_ref.reshape(1, -1, 1, 1) + 1e-5)
    ref_rm = 0.1 * mean_ref + 0.9 * running_mean
    ref_rv = 0.1 * var_ref * n_ref / (n_ref - 1) + 0.9 * running_var

    assert jnp.allclose(out, ref_out, atol=1e-4, rtol=1e-4), \
        float(jnp.max(jnp.abs(out - ref_out)))
    assert jnp.allclose(new_rm, ref_rm, atol=1e-5)
    assert jnp.allclose(new_rv, ref_rv, atol=1e-5)
    assert int(new_nbt) == 1

    # --- eval path (uses running stats, no update) ---
    out_eval, rm_e, rv_e, _ = dynamic_norm_forward(
        x, new_rm, new_rv, weight, bias, new_nbt,
        eps=1e-5, momentum=0.1, affine=False,
        track_running_stats=True, training=False)
    ref_eval = (x - new_rm.reshape(1, -1, 1, 1)) / jnp.sqrt(
        new_rv.reshape(1, -1, 1, 1) + 1e-5)
    assert jnp.allclose(out_eval, ref_eval, atol=1e-4, rtol=1e-4)
    assert jnp.allclose(rm_e, new_rm) and jnp.allclose(rv_e, new_rv)

    # --- 2-D training path ---
    x2 = jax.random.normal(jax.random.PRNGKey(1), (16, 32), dtype=jnp.float32)
    out2, _, _, _ = dynamic_norm_forward(
        x2, jnp.zeros((32,), jnp.float32), jnp.ones((32,), jnp.float32),
        None, None, jnp.array(0, jnp.int32),
        eps=1e-5, momentum=0.1, affine=False,
        track_running_stats=True, training=True)
    m2 = x2.mean(axis=0)
    v2 = ((x2 - m2) ** 2).mean(axis=0)
    ref2 = (x2 - m2) / jnp.sqrt(v2 + 1e-5)
    assert jnp.allclose(out2, ref2, atol=1e-4, rtol=1e-4)

    jax.block_until_ready((out_eval, out2))
    print("KERNEL_OK")
</pallas_src>

<mosaic_0001>
module attributes {stable_mosaic.version = 11 : i64} {
  func.func @_row_stats_kernel(%arg0: i32, %arg1: memref<8x256xf32, #tpu.memory_space<vmem>>, %arg2: memref<8x1xf32, #tpu.memory_space<vmem>>, %arg3: memref<8x1xf32, #tpu.memory_space<vmem>>) attributes {dimension_semantics = [#tpu.dimension_semantics<parallel>], iteration_bounds = array<i64: 1>, scalar_prefetch = 0 : i64, scratch_operands = 0 : i64, tpu.core_type = #tpu.core_type<tc>, window_params = [{transform_indices = @transform_0, window_bounds = array<i64: 8, 256>}, {transform_indices = @transform_1, window_bounds = array<i64: 8, 1>}, {transform_indices = @transform_2, window_bounds = array<i64: 8, 1>}]} {
    %c0 = arith.constant 0 : index
    %c0_0 = arith.constant 0 : index
    %0 = vector.load %arg1[%c0, %c0_0] : memref<8x256xf32, #tpu.memory_space<vmem>>, vector<8x256xf32>
    %cst = arith.constant dense<0.000000e+00> : vector<8xf32>
    %1 = vector.multi_reduction <add>, %0, %cst [1] : vector<8x256xf32> to vector<8xf32>
    %2 = vector.shape_cast %1 : vector<8xf32> to vector<8x1xf32>
    %c0_1 = arith.constant 0 : index
    %c0_2 = arith.constant 0 : index
    %3 = vector.load %arg2[%c0_1, %c0_2] : memref<8x1xf32, #tpu.memory_space<vmem>>, vector<8x1xf32>
    tpu.vector_store %arg2[%c0_1, %c0_2], %2 {strides = array<i32>} : memref<8x1xf32, #tpu.memory_space<vmem>>, vector<8x1xf32>,
    %4 = arith.mulf %0, %0 : vector<8x256xf32>
    %cst_3 = arith.constant dense<0.000000e+00> : vector<8xf32>
    %5 = vector.multi_reduction <add>, %4, %cst_3 [1] : vector<8x256xf32> to vector<8xf32>
    %6 = vector.shape_cast %5 : vector<8xf32> to vector<8x1xf32>
    %c0_4 = arith.constant 0 : index
    %c0_5 = arith.constant 0 : index
    %7 = vector.load %arg3[%c0_4, %c0_5] : memref<8x1xf32, #tpu.memory_space<vmem>>, vector<8x1xf32>
    tpu.vector_store %arg3[%c0_4, %c0_5], %6 {strides = array<i32>} : memref<8x1xf32, #tpu.memory_space<vmem>>, vector<8x1xf32>,
    return
  }
  func.func @transform_0(%arg0: i32) -> (i32, i32) {
    %c0_i32 = arith.constant 0 : i32
    %c0_i32_0 = arith.constant 0 : i32
    return %arg0, %c0_i32 : i32, i32
  }
  func.func @transform_1(%arg0: i32) -> (i32, i32) {
    %c0_i32 = arith.constant 0 : i32
    %c0_i32_0 = arith.constant 0 : i32
    return %arg0, %c0_i32 : i32, i32
  }
  func.func @transform_2(%arg0: i32) -> (i32, i32) {
    %c0_i32 = arith.constant 0 : i32
    %c0_i32_0 = arith.constant 0 : i32
    return %arg0, %c0_i32 : i32, i32
  }
}

</mosaic_0001>

<bundles_post_ra>
// kernel: tpu_custom_call.1
= control target key start
LH: loop header
LB: loop body
LE: loop exit
PB: predicated region body
PF: predicated region fallthrough
CT: control target
= control target key end

     0   :  { %8 = vsyncpa [#allocation3], 0  ;;  %s69_s9 = smov [#allocation2]   ;;  %s103_s0 = inlined_call_operand.hbm [shape: f32[8,256], index: 0, kind: input, shape index: {}]   ;;  %s104_s1 = inlined_call_operand.vmem [shape: f32[8,1], index: 1, kind: output, shape index: {0}]   ;;  %s105_s2 = inlined_call_operand.vmem [shape: f32[8,1], index: 2, kind: output, shape index: {1}]  }
   0x1   :  { %s15_s10 = sshll.u32 %s69_s9, 4  ;;  %s45_s13 = scalar_lea.hbm %s103_s0, 256  ;;  %s16_s10 = int_to_ptr.vmem [resolvable:$true] %s15_s10 }
   0x2   :  { %p46_p0 = scmp.ne.s32.totalorder %s103_s0, %s45_s13  ;;  %p49_p1 = scmp.lt.u32.totalorder %s45_s13, %s103_s0 }
   0x4   :  { %p51_p2 = pnand %p49_p1, %p46_p0 }
   0x6   :  { %54 = shalt.err (!%p51_p2)
}
   0x7   :  { %s55_s18 = scalar_lea.vmem %s16_s10, 256  ;;  %p60_p4 = scmp.lt.s32.totalorder %s16_s10, %s16_s10 }
   0x8   :  { %p56_p3 = scmp.ne.s32.totalorder %s16_s10, %s55_s18  ;;  %p61_p5 = scmp.lt.s32.totalorder %s55_s18, %s55_s18 }
   0xa   :  { %p62_p6 = por %p61_p5, %p60_p4 }
   0xc   :  { %p63_p7 = pnand %p62_p6, %p56_p3 }
   0xe   :  { %66 = shalt.err (!%p63_p7)
}
   0xf   :  { %18 = dma.hbm_to_vmem [thread:$0]  %s103_s0, 256, %s16_s10, [#allocation3]  }
  0x10   :  { %67 = dma.done.wait [#allocation3], 256  }
  0x11   :  { %68 = vsyncadd [#allocation3], 4294967040  ;;  %v22_v0 = vld [vmem:[#allocation2] sm:$0xff]  ;;  %v23_v1 = vld [vmem:[#allocation2 + $0x8] sm:$0xff]  ;;  %vm27_vm0 = vcmask 7168  }
  0x12   :  { %v24_v2 = vadd.f32 %v23_v1, %v22_v0  ;;  %v29_v3 = vmul.f32 %v22_v0, %v22_v0  ;;  %v30_v4 = vmul.f32 %v23_v1, %v23_v1 }
  0x14   :  { %25 = vadd.xlane.f32.xlu0 %v24_v2  ;;  %v31_v5 = vadd.f32 %v30_v4, %v29_v3 }
  0x18   :  { %32 = vadd.xlane.f32.xlu0 %v31_v5 }
  0xa1   :  { %v26_v6 = vpop.xlane.xlu0 %25 }
  0xa2   :  { %28 = vst.msk [vmem:[%s104_s1] sm:$0xff] %vm27_vm0, %v26_v6 }
  0xa5   :  { %v33_v7 = vpop.xlane.xlu0 %32 }
  0xa6   :  { %34 = vst.msk [vmem:[%s105_s2] sm:$0xff] %vm27_vm0, %v33_v7 }
  0xa7   :  { %43 = vsyncpa [#allocation3], 1 }

</bundles_post_ra>
